<compile_context>
chip_gen: v6e
topology: v6e:2x2x1
jax: 0.10.0
libtpu: 0.0.40
codegen_flags: <defaults>
</compile_context>

<pallas_src>
import jax
import jax.numpy as jnp
from jax.experimental import pallas as pl
from jax.experimental.pallas import tpu as pltpu

_LANES = 512        # 128 batch elements * 4 interleaved features per row
_PARAM_ROWS = 16    # lane-periodic weight vectors (rows 0..9 used), 8-multiple


def _round_up(n, m):
    return ((n + m - 1) // m) * m


def _mlp_kernel(w_ref, x_ref, o_ref):
    """Fused forward on one (TR, 512) tile in the interleaved lane layout.

    Lane l holds feature j = l % 4 of batch element b = 128*row + l // 4:
      input : j = s*2 + d  ->  x[b, s, d]
      output: j = o*2 + q  ->  out[b, o, q]
    w_ref: (16, 512) lane-periodic weight vectors (see pack_lane_params);
           each (1, 512) row broadcasts over sublanes in the multiplies.
    """
    x = x_ref[...]                                   # single lane-dense load

    a_self = w_ref[0:1, :]
    a_nxt = w_ref[1:2, :]
    a_prv = w_ref[2:3, :]
    a_b = w_ref[3:4, :]
    b_self = w_ref[4:5, :]
    b_nxt = w_ref[5:6, :]
    b_prv = w_ref[6:7, :]
    b_b = w_ref[7:8, :]
    c_dw = w_ref[8:9, :]
    c_db = w_ref[9:10, :]

    # pltpu.roll matches jnp.roll: roll(x, k)[l] = x[(l - k) % n].  To bring the
    # value from lane l+K to lane l we use shift = n - K (kept positive).
    x_nxt2 = pltpu.roll(x, shift=_LANES - 2, axis=1)   # x at lane l+2
    x_prv2 = pltpu.roll(x, shift=2, axis=1)            # x at lane l-2

    # Stage 1: x2[b, d, o] = relu(linear1(x.permute(0,2,1))), stored at lane
    # offset 2*o + d.  Wrong-direction roll terms are zeroed by a_nxt / a_prv.
    y = jnp.maximum(x * a_self + x_nxt2 * a_nxt + x_prv2 * a_prv + a_b, 0.0)

    y_nxt1 = pltpu.roll(y, shift=_LANES - 1, axis=1)   # y at lane l+1
    y_prv1 = pltpu.roll(y, shift=1, axis=1)            # y at lane l-1

    # Stage 2: v5[b, o] = relu(linear2(x2.permute(0,2,1))), replicated at lane
    # offsets 2*o and 2*o + 1.
    v5 = jnp.maximum(y * b_self + y_nxt1 * b_nxt + y_prv1 * b_prv + b_b, 0.0)

    # Stage 3: 2-way softmax of linear3(v5) as a per-lane sigmoid of the
    # (own - other) logit difference; single unmasked full-tile store.
    o_ref[...] = jax.nn.sigmoid(v5 * c_dw + c_db)


def pack_lane_params(w1, b1, w2, b2, w3, b3):
    """Build the (16, 512) lane-periodic weight vectors consumed by the kernel.

    Per lane: f = lane % 4, o = f // 2, parity = f % 2 (d for stage 1/2, q for
    the softmax stage).
    """
    f = jnp.arange(_LANES) % 4
    o0 = (f // 2) == 0           # lanes belonging to output feature o == 0
    even = (f % 2) == 0

    w1 = w1.astype(jnp.float32); b1 = b1.astype(jnp.float32)
    w2 = w2.astype(jnp.float32); b2 = b2.astype(jnp.float32)
    w3 = w3.astype(jnp.float32); b3 = b3.astype(jnp.float32)
    zero = jnp.float32(0.0)

    a_self = jnp.where(o0, w1[0, 0], w1[1, 1])    # weight of x at this lane
    a_nxt = jnp.where(o0, w1[0, 1], zero)         # weight of x at lane l+2
    a_prv = jnp.where(o0, zero, w1[1, 0])         # weight of x at lane l-2
    a_b = jnp.where(o0, b1[0], b1[1])

    b_self = jnp.where(even, w2[0, 0], w2[0, 1])
    b_nxt = jnp.where(even, w2[0, 1], zero)       # weight of y at lane l+1
    b_prv = jnp.where(even, zero, w2[0, 0])       # weight of y at lane l-1
    b_b = jnp.full((_LANES,), b2[0], jnp.float32)

    dw = w3[1, 0] - w3[0, 0]
    db = b3[1] - b3[0]
    c_dw = jnp.where(even, -dw, dw)               # own-minus-other logit slope
    c_db = jnp.where(even, -db, db)

    rows = jnp.stack([a_self, a_nxt, a_prv, a_b,
                      b_self, b_nxt, b_prv, b_b,
                      c_dw, c_db], axis=0)
    pad = jnp.zeros((_PARAM_ROWS - rows.shape[0], _LANES), jnp.float32)
    return jnp.concatenate([rows, pad], axis=0)


def _choose_tile_rows(R):
    """Rows (of 512 lanes) per grid step: ~4 MiB per buffer, >=~4 steps when
    the batch is large enough (keeps both v7x TensorCores busy)."""
    if R <= 8:
        return R                       # full-array block (equals array dim)
    max_rows = 2048                    # (2048, 512) f32 = 4 MiB per buffer
    return max(8, min(max_rows, _round_up(pl.cdiv(R, 4), 8)))


@jax.jit
def model_forward(x, lane_params):
    """x: (B, 2, 2) float32 -> softmax output (B, 2, 2) float32."""
    B = x.shape[0]
    n = B * 4
    xf = x.astype(jnp.float32).reshape(n)          # free row-major flatten
    n_pad = _round_up(n, _LANES)                   # pad <= 127 batch elements
    if n_pad != n:
        xf = jnp.pad(xf, (0, n_pad - n))
    R = n_pad // _LANES
    xf = xf.reshape(R, _LANES)                     # free reshape (row-major)

    tr = _choose_tile_rows(R)
    grid = (pl.cdiv(R, tr),)

    out = pl.pallas_call(
        _mlp_kernel,
        out_shape=jax.ShapeDtypeStruct((R, _LANES), jnp.float32),
        grid=grid,
        in_specs=[
            pl.BlockSpec((_PARAM_ROWS, _LANES), lambda i: (0, 0)),
            pl.BlockSpec((tr, _LANES), lambda i: (i, 0)),
        ],
        out_specs=pl.BlockSpec((tr, _LANES), lambda i: (i, 0)),
        compiler_params=pltpu.CompilerParams(
            dimension_semantics=("parallel",),
            vmem_limit_bytes=32 * 1024 * 1024,
        ),
    )(lane_params, xf)

    # Free reshapes; the slice only copies when B is not a multiple of 128.
    return out.reshape(n_pad)[:n].reshape(B, 2, 2)


def init_params(key):
    """torch.nn.Linear-style init: U(-1/sqrt(in_f), +1/sqrt(in_f))."""
    ks = jax.random.split(key, 6)

    def lin(kw, kb, out_f, in_f):
        bound = 1.0 / float(in_f) ** 0.5
        w = jax.random.uniform(kw, (out_f, in_f), jnp.float32, -bound, bound)
        b = jax.random.uniform(kb, (out_f,), jnp.float32, -bound, bound)
        return w, b

    w1, b1 = lin(ks[0], ks[1], 2, 2)   # Linear(2, 2)
    w2, b2 = lin(ks[2], ks[3], 1, 2)   # Linear(2, 1)
    w3, b3 = lin(ks[4], ks[5], 2, 1)   # Linear(1, 2)
    return w1, b1, w2, b2, w3, b3


def reference(x, w1, b1, w2, b2, w3, b3):
    """Pure-JAX reference matching the fixed semantics (for verification)."""
    v1 = jnp.transpose(x, (0, 2, 1))
    x2 = jnp.maximum(v1 @ w1.T + b1, 0.0)
    v3 = jnp.transpose(x2, (0, 2, 1))
    v5 = jnp.maximum(v3 @ w2.T + b2, 0.0)        # (B, 2, 1)
    v7 = v5 @ w3.T + b3                          # (B, 2, 2)
    return jax.nn.softmax(v7, axis=-1)


if __name__ == "__main__":
    key = jax.random.PRNGKey(0)
    k_x1, k_x2, k_p = jax.random.split(key, 3)

    w1, b1, w2, b2, w3, b3 = init_params(k_p)
    lane_params = pack_lane_params(w1, b1, w2, b2, w3, b3)

    # Small shape consistent with the module's (B, 2, 2) input.
    B = 4
    x = jax.random.normal(k_x1, (B, 2, 2), dtype=jnp.float32)
    out = jax.block_until_ready(model_forward(x, lane_params))
    ref = reference(x, w1, b1, w2, b2, w3, b3)
    assert out.shape == (B, 2, 2)
    assert jnp.allclose(out, ref, atol=1e-5, rtol=1e-5), (out, ref)

    # A batch that is not a multiple of 128 (exercises the ragged tail path).
    B2 = 300
    xb = jax.random.normal(k_x2, (B2, 2, 2), dtype=jnp.float32)
    out2 = jax.block_until_ready(model_forward(xb, lane_params))
    ref2 = reference(xb, w1, b1, w2, b2, w3, b3)
    assert jnp.allclose(out2, ref2, atol=1e-5, rtol=1e-5)

    print("KERNEL_OK")
</pallas_src>

<mosaic_0001>
module attributes {stable_mosaic.version = 11 : i64} {
  func.func @_mlp_kernel(%arg0: i32, %arg1: memref<16x512xf32, #tpu.memory_space<vmem>>, %arg2: memref<1x512xf32, #tpu.memory_space<vmem>>, %arg3: memref<1x512xf32, #tpu.memory_space<vmem>>) attributes {dimension_semantics = [#tpu.dimension_semantics<parallel>], iteration_bounds = array<i64: 1>, scalar_prefetch = 0 : i64, scratch_operands = 0 : i64, tpu.core_type = #tpu.core_type<tc>, window_params = [{pipeline_mode = #tpu.pipeline_mode<synchronous>, transform_indices = @transform_0, window_bounds = array<i64: 16, 512>}, {transform_indices = @transform_1, window_bounds = array<i64: 1, 512>}, {transform_indices = @transform_2, window_bounds = array<i64: 1, 512>}]} {
    %c0 = arith.constant 0 : index
    %c0_0 = arith.constant 0 : index
    %0 = vector.load %arg2[%c0, %c0_0] : memref<1x512xf32, #tpu.memory_space<vmem>>, vector<1x512xf32>
    %c0_1 = arith.constant 0 : index
    %c0_2 = arith.constant 0 : index
    %1 = vector.load %arg1[%c0_1, %c0_2] : memref<16x512xf32, #tpu.memory_space<vmem>>, vector<1x512xf32>
    %c1 = arith.constant 1 : index
    %c0_3 = arith.constant 0 : index
    %2 = vector.load %arg1[%c1, %c0_3] : memref<16x512xf32, #tpu.memory_space<vmem>>, vector<1x512xf32>
    %c2 = arith.constant 2 : index
    %c0_4 = arith.constant 0 : index
    %3 = vector.load %arg1[%c2, %c0_4] : memref<16x512xf32, #tpu.memory_space<vmem>>, vector<1x512xf32>
    %c3 = arith.constant 3 : index
    %c0_5 = arith.constant 0 : index
    %4 = vector.load %arg1[%c3, %c0_5] : memref<16x512xf32, #tpu.memory_space<vmem>>, vector<1x512xf32>
    %c4 = arith.constant 4 : index
    %c0_6 = arith.constant 0 : index
    %5 = vector.load %arg1[%c4, %c0_6] : memref<16x512xf32, #tpu.memory_space<vmem>>, vector<1x512xf32>
    %c5 = arith.constant 5 : index
    %c0_7 = arith.constant 0 : index
    %6 = vector.load %arg1[%c5, %c0_7] : memref<16x512xf32, #tpu.memory_space<vmem>>, vector<1x512xf32>
    %c6 = arith.constant 6 : index
    %c0_8 = arith.constant 0 : index
    %7 = vector.load %arg1[%c6, %c0_8] : memref<16x512xf32, #tpu.memory_space<vmem>>, vector<1x512xf32>
    %c7 = arith.constant 7 : index
    %c0_9 = arith.constant 0 : index
    %8 = vector.load %arg1[%c7, %c0_9] : memref<16x512xf32, #tpu.memory_space<vmem>>, vector<1x512xf32>
    %c8 = arith.constant 8 : index
    %c0_10 = arith.constant 0 : index
    %9 = vector.load %arg1[%c8, %c0_10] : memref<16x512xf32, #tpu.memory_space<vmem>>, vector<1x512xf32>
    %c9 = arith.constant 9 : index
    %c0_11 = arith.constant 0 : index
    %10 = vector.load %arg1[%c9, %c0_11] : memref<16x512xf32, #tpu.memory_space<vmem>>, vector<1x512xf32>
    %c510_i32 = arith.constant 510 : i32
    %11 = tpu.dynamic_rotate %0 by %c510_i32 dim 1 : vector<1x512xf32>, i32 -> vector<1x512xf32>
    %c2_i32 = arith.constant 2 : i32
    %12 = tpu.dynamic_rotate %0 by %c2_i32 dim 1 : vector<1x512xf32>, i32 -> vector<1x512xf32>
    %13 = arith.mulf %0, %1 : vector<1x512xf32>
    %14 = arith.mulf %11, %2 : vector<1x512xf32>
    %15 = arith.addf %13, %14 : vector<1x512xf32>
    %16 = arith.mulf %12, %3 : vector<1x512xf32>
    %17 = arith.addf %15, %16 : vector<1x512xf32>
    %18 = arith.addf %17, %4 : vector<1x512xf32>
    %cst = arith.constant 0.000000e+00 : f32
    %19 = vector.broadcast %cst : f32 to vector<1x512xf32>
    %20 = arith.maximumf %18, %19 : vector<1x512xf32>
    %c511_i32 = arith.constant 511 : i32
    %21 = tpu.dynamic_rotate %20 by %c511_i32 dim 1 : vector<1x512xf32>, i32 -> vector<1x512xf32>
    %c1_i32 = arith.constant 1 : i32
    %22 = tpu.dynamic_rotate %20 by %c1_i32 dim 1 : vector<1x512xf32>, i32 -> vector<1x512xf32>
    %23 = arith.mulf %20, %5 : vector<1x512xf32>
    %24 = arith.mulf %21, %6 : vector<1x512xf32>
    %25 = arith.addf %23, %24 : vector<1x512xf32>
    %26 = arith.mulf %22, %7 : vector<1x512xf32>
    %27 = arith.addf %25, %26 : vector<1x512xf32>
    %28 = arith.addf %27, %8 : vector<1x512xf32>
    %cst_12 = arith.constant 0.000000e+00 : f32
    %29 = vector.broadcast %cst_12 : f32 to vector<1x512xf32>
    %30 = arith.maximumf %28, %29 : vector<1x512xf32>
    %31 = arith.mulf %30, %9 : vector<1x512xf32>
    %32 = arith.addf %31, %10 : vector<1x512xf32>
    %33 = arith.negf %32 : vector<1x512xf32>
    %34 = math.exp %33 : vector<1x512xf32>
    %cst_13 = arith.constant 1.000000e+00 : f32
    %35 = vector.broadcast %cst_13 : f32 to vector<1x512xf32>
    %36 = arith.addf %35, %34 : vector<1x512xf32>
    %37 = arith.divf %35, %36 : vector<1x512xf32>
    %c0_14 = arith.constant 0 : index
    %c0_15 = arith.constant 0 : index
    %38 = vector.load %arg3[%c0_14, %c0_15] : memref<1x512xf32, #tpu.memory_space<vmem>>, vector<1x512xf32>
    tpu.vector_store %arg3[%c0_14, %c0_15], %37 {strides = array<i32>} : memref<1x512xf32, #tpu.memory_space<vmem>>, vector<1x512xf32>,
    return
  }
  func.func @transform_0(%arg0: i32) -> (i32, i32) {
    %c0_i32 = arith.constant 0 : i32
    %c0_i32_0 = arith.constant 0 : i32
    %c0_i32_1 = arith.constant 0 : i32
    return %c0_i32, %c0_i32_0 : i32, i32
  }
  func.func @transform_1(%arg0: i32) -> (i32, i32) {
    %c0_i32 = arith.constant 0 : i32
    %c0_i32_0 = arith.constant 0 : i32
    return %arg0, %c0_i32 : i32, i32
  }
  func.func @transform_2(%arg0: i32) -> (i32, i32) {
    %c0_i32 = arith.constant 0 : i32
    %c0_i32_0 = arith.constant 0 : i32
    return %arg0, %c0_i32 : i32, i32
  }
}

</mosaic_0001>

<bundles_post_ra>
// kernel: model_forward.1
= control target key start
LH: loop header
LB: loop body
LE: loop exit
PB: predicated region body
PF: predicated region fallthrough
CT: control target
= control target key end

     0   :  { %7 = vsyncpa [#allocation3], 0  ;;  %s420_s9 = smov [#allocation2]   ;;  %s530_s0 = inlined_call_operand.hbm [shape: f32[16,512], index: 0, kind: input, shape index: {}]   ;;  %s531_s1 = inlined_call_operand.vmem [shape: f32[1,512], index: 1, kind: input, shape index: {}]   ;;  %s532_s2 = inlined_call_operand.vmem [shape: f32[1,512], index: 2, kind: output, shape index: {}]  }
   0x1   :  { %s13_s10 = sshll.u32 %s420_s9, 4  ;;  %s14_s10 = int_to_ptr.vmem [resolvable:$true] %s13_s10 }
   0x2   :  { %s406_s11 = scalar_lea.vmem %s14_s10, 1024  ;;  %p411_p1 = scmp.lt.s32.totalorder %s14_s10, %s14_s10 }
   0x3   :  { %p407_p0 = scmp.ne.s32.totalorder %s14_s10, %s406_s11  ;;  %p412_p2 = scmp.lt.s32.totalorder %s406_s11, %s406_s11 }
   0x5   :  { %p413_p3 = por %p412_p2, %p411_p1 }
   0x7   :  { %p414_p4 = pnand %p413_p3, %p407_p0 }
   0x9   :  { %417 = shalt.err (!%p414_p4)
}
   0xa   :  { %s421_s12 = smov 512   ;;  %s422_s13 = smov 32  }
   0xb   :  { %19 = dma.hbm_to_vmem [thread:$0]  %s530_s0, 1024, %s14_s10, [#allocation3], %s421_s12, %s421_s12, %s422_s13  }
   0xc   :  { %418 = dma.done.wait [#allocation3], 1024  }
   0xd   :  { %419 = vsyncadd [#allocation3], 4294966272  ;;  %v46_v0 = vlaneseq  ;;  %v458_v6 = vld [vmem:[%s531_s1] sm:$0xf]  ;;  %s423_s0 = smov 126   ;;  %s424_s18 = smov 2  }
   0xe   :  { %v425_v11 = vmov 1966171168   ;;  %v28_v14 = vld [vmem:[#allocation2 + $0x1] ss:$8 sm:$0xf]  ;;  %s426_s1 = smov 127  }
   0xf   :  { %v47_v1 = vshrl.u32 %v46_v0, 7  ;;  %v127_v12 = vunpack.c.l.s4 %v425_v11  ;;  %v469_v13 = vand.u32 127, %v46_v0  ;;  %v30_v33 = vld [vmem:[#allocation2 + $0x2] ss:$8 sm:$0xf]  ;;  %s427_s19 = smov 1  }
  0x10   :  { %v26_v55 = vld [vmem:[#allocation2] ss:$8 sm:$0xf]  ;;  %vm377_vm4 = vcmp.lt.s32.totalorder %v46_v0, 512 }
  0x11   :  { %v447_v2 = vsub.s32 2, %v47_v1  ;;  %v449_v3 = vsub.s32 0, %v47_v1  ;;  %v451_v4 = vsub.s32 3, %v47_v1  ;;  %v453_v5 = vsub.s32 1, %v47_v1 }
  0x12   :  { %v128_v15 = vunpack.c.0.s8 %v127_v12  ;;  %vm76_vm0 = vcmp.lt.s32.totalorder %v469_v13, 126  ;;  %vm89_vm1 = vcmp.lt.s32.totalorder %v469_v13, 2  ;;  %v94_v58 = vmul.f32 %v26_v55, %v458_v6 }
  0x13   :  { %v57_v7 = vrot.slane %v458_v6, %v447_v2  ;;  %v49_v8 = vrot.slane %v458_v6, %v449_v3  ;;  %v61_v9 = vrot.slane %v458_v6, %v451_v4  ;;  %v53_v10 = vrot.slane %v458_v6, %v453_v5 }
  0x14   :  { %v107_v18 = vrot.slane %v28_v14, %v447_v2  ;;  %v111_v19 = vrot.slane %v28_v14, %v451_v4  ;;  %v99_v20 = vrot.slane %v28_v14, %v449_v3  ;;  %v103_v21 = vrot.slane %v28_v14, %v453_v5 }
  0x15   :  { %70 = vrot.lane.b32.xlu1 %v57_v7, %s423_s0  ;;  %66 = vrot.lane.b32.xlu0 %v49_v8, %s423_s0  ;;  %v476_v22 = vsub.s32 %v128_v15, %v47_v1  ;;  %v158_v38 = vrot.slane %v30_v33, %v453_v5  ;;  %v154_v39 = vrot.slane %v30_v33, %v449_v3  ;;  %v36_v15 = vld [vmem:[#allocation2 + $0x5] ss:$8 sm:$0xf]  ;;  %vm236_vm2 = vcmp.lt.s32.totalorder %v469_v13, 127 }
  0x16   :  { %v162_v40 = vrot.slane %v30_v33, %v447_v2  ;;  %v166_v44 = vrot.slane %v30_v33, %v451_v4  ;;  %v38_v33 = vld [vmem:[#allocation2 + $0x6] ss:$8 sm:$0xf]  ;;  %vm249_vm3 = vcmp.lt.s32.totalorder %v469_v13, 1 }
  0x17   :  { %v40_v13 = vld [vmem:[#allocation2 + $0x7] ss:$8 sm:$0xf] }
  0x19   :  { %72 = vrot.lane.b32.xlu1 %v61_v9, %s423_s0  ;;  %68 = vrot.lane.b32.xlu0 %v53_v10, %s423_s0 }
  0x1d   :  { %83 = vrot.lane.b32.xlu1 %v53_v10, %s424_s18  ;;  %81 = vrot.lane.b32.xlu0 %v49_v8, %s424_s18 }
  0x21   :  { %87 = vrot.lane.b32.xlu1 %v61_v9, %s424_s18  ;;  %85 = vrot.lane.b32.xlu0 %v57_v7, %s424_s18  ;;  %v32_v7 = vld [vmem:[#allocation2 + $0x3] ss:$8 sm:$0xf] }
  0x87   :  { %v71_v16 = vpop.permute.xlu1 %70  ;;  %v67_v17 = vpop.permute.xlu0 %66 }
  0x8b   :  { %v73_v23 = vpop.permute.xlu1 %72  ;;  %v69_v24 = vpop.permute.xlu0 %68 }
  0x8c   :  { %v77_v25 = vsel %vm76_vm0, %v71_v16, %v73_v23  ;;  %v80_v26 = vsel %vm76_vm0, %v73_v23, %v67_v17  ;;  %v78_v27 = vsel %vm76_vm0, %v69_v24, %v71_v16  ;;  %v79_v28 = vsel %vm76_vm0, %v67_v17, %v69_v24 }
  0x8d   :  { %v118_v29 = vmul.f32 %v107_v18, %v77_v25  ;;  %v119_v30 = vmul.f32 %v111_v19, %v80_v26  ;;  %v116_v31 = vmul.f32 %v99_v20, %v79_v28  ;;  %v117_v32 = vmul.f32 %v103_v21, %v78_v27 }
  0x8e   :  { %v259_v18 = vrot.slane %v36_v15, %v449_v3  ;;  %v271_v19 = vrot.slane %v36_v15, %v451_v4  ;;  %v263_v20 = vrot.slane %v36_v15, %v453_v5  ;;  %v267_v21 = vrot.slane %v36_v15, %v447_v2 }
  0x8f   :  { %v125_v34 = vcombine.low %v118_v29, %v119_v30  ;;  %v124_v35 = vcombine.low %v116_v31, %v117_v32  ;;  %v84_v36 = vpop.permute.xlu1 %83  ;;  %v82_v37 = vpop.permute.xlu0 %81 }
  0x90   :  { %v92_v43 = vsel %vm89_vm1, %v82_v37, %v84_v36 }
  0x91   :  { %v139_v41 = vrot.slane %v125_v34, %v476_v22  ;;  %v132_v42 = vrot.slane %v124_v35, %v476_v22  ;;  %v172_v47 = vmul.f32 %v158_v38, %v92_v43  ;;  %v318_v38 = vrot.slane %v38_v33, %v453_v5 }
  0x93   :  { %v88_v45 = vpop.permute.xlu1 %87  ;;  %v86_v46 = vpop.permute.xlu0 %85  ;;  %v140_v51 = vcombine.low %v132_v42, %v139_v41 }
  0x94   :  { %v93_v48 = vsel %vm89_vm1, %v88_v45, %v82_v37  ;;  %v90_v49 = vsel %vm89_vm1, %v86_v46, %v88_v45  ;;  %v91_v50 = vsel %vm89_vm1, %v84_v36, %v86_v46 }
  0x95   :  { %v171_v52 = vmul.f32 %v154_v39, %v93_v48  ;;  %v173_v53 = vmul.f32 %v162_v40, %v91_v50  ;;  %v174_v54 = vmul.f32 %v166_v44, %v90_v49  ;;  %v147_v59 = vrot.slane %v140_v51, %v476_v22 }
  0x96   :  { %v314_v39 = vrot.slane %v38_v33, %v449_v3  ;;  %v322_v40 = vrot.slane %v38_v33, %v447_v2  ;;  %v326_v44 = vrot.slane %v38_v33, %v451_v4 }
  0x97   :  { %v179_v56 = vcombine.low %v171_v52, %v172_v47  ;;  %v180_v57 = vcombine.low %v173_v53, %v174_v54  ;;  %v149_v63 = vadd.f32 %v147_v59, %v94_v58  ;;  %v34_v54 = vld [vmem:[#allocation2 + $0x4] ss:$8 sm:$0xf] }
  0x99   :  { %v187_v60 = vrot.slane %v179_v56, %v476_v22  ;;  %v194_v61 = vrot.slane %v180_v57, %v476_v22 }
  0x9b   :  { %v195_v62 = vcombine.low %v187_v60, %v194_v61 }
  0x9d   :  { %v202_v1 = vrot.slane %v195_v62, %v476_v22 }
  0x9f   :  { %v204_v8 = vadd.f32 %v202_v1, %v149_v63  ;;  %v42_v63 = vld [vmem:[#allocation2 + $0x20] ss:$8 sm:$0xf] }
  0xa1   :  { %v205_v9 = vadd.f32 %v204_v8, %v32_v7  ;;  %v44_v7 = vld [vmem:[#allocation2 + $0x21] ss:$8 sm:$0xf] }
  0xa3   :  { %v206_v10 = vmax.f32 %v205_v9, 0.0 }
  0xa5   :  { %v215_v11 = vrot.slane %v206_v10, %v453_v5  ;;  %v211_v12 = vrot.slane %v206_v10, %v449_v3  ;;  %v223_v6 = vrot.slane %v206_v10, %v451_v4  ;;  %v219_v14 = vrot.slane %v206_v10, %v447_v2 }
  0xa6   :  { %v254_v57 = vmul.f32 %v206_v10, %v34_v54 }
  0xa7   :  { %230 = vrot.lane.b32.xlu1 %v215_v11, %s426_s1  ;;  %228 = vrot.lane.b32.xlu0 %v211_v12, %s426_s1 }
  0xab   :  { %234 = vrot.lane.b32.xlu1 %v223_v6, %s426_s1  ;;  %232 = vrot.lane.b32.xlu0 %v219_v14, %s426_s1 }
  0xaf   :  { %243 = vrot.lane.b32.xlu1 %v215_v11, %s427_s19  ;;  %241 = vrot.lane.b32.xlu0 %v211_v12, %s427_s19 }
  0xb3   :  { %247 = vrot.lane.b32.xlu1 %v223_v6, %s427_s19  ;;  %245 = vrot.lane.b32.xlu0 %v219_v14, %s427_s19 }
 0x119   :  { %v231_v16 = vpop.permute.xlu1 %230  ;;  %v229_v17 = vpop.permute.xlu0 %228 }
 0x11a   :  { %v239_v23 = vsel %vm236_vm2, %v229_v17, %v231_v16 }
 0x11b   :  { %v276_v29 = vmul.f32 %v259_v18, %v239_v23 }
 0x11d   :  { %v235_v24 = vpop.permute.xlu1 %234  ;;  %v233_v25 = vpop.permute.xlu0 %232 }
 0x11e   :  { %v240_v26 = vsel %vm236_vm2, %v235_v24, %v229_v17  ;;  %v237_v27 = vsel %vm236_vm2, %v233_v25, %v235_v24  ;;  %v238_v28 = vsel %vm236_vm2, %v231_v16, %v233_v25 }
 0x11f   :  { %v279_v30 = vmul.f32 %v271_v19, %v240_v26  ;;  %v277_v31 = vmul.f32 %v263_v20, %v238_v28  ;;  %v278_v32 = vmul.f32 %v267_v21, %v237_v27 }
 0x121   :  { %v284_v34 = vcombine.low %v276_v29, %v277_v31  ;;  %v285_v35 = vcombine.low %v278_v32, %v279_v30  ;;  %v244_v36 = vpop.permute.xlu1 %243  ;;  %v242_v37 = vpop.permute.xlu0 %241 }
 0x122   :  { %v252_v43 = vsel %vm249_vm3, %v242_v37, %v244_v36 }
 0x123   :  { %v292_v41 = vrot.slane %v284_v34, %v476_v22  ;;  %v299_v42 = vrot.slane %v285_v35, %v476_v22  ;;  %v332_v47 = vmul.f32 %v318_v38, %v252_v43 }
 0x125   :  { %v248_v45 = vpop.permute.xlu1 %247  ;;  %v246_v46 = vpop.permute.xlu0 %245  ;;  %v300_v5 = vcombine.low %v292_v41, %v299_v42 }
 0x126   :  { %v253_v48 = vsel %vm249_vm3, %v248_v45, %v242_v37  ;;  %v250_v3 = vsel %vm249_vm3, %v246_v46, %v248_v45  ;;  %v251_v2 = vsel %vm249_vm3, %v244_v36, %v246_v46 }
 0x127   :  { %v331_v49 = vmul.f32 %v314_v39, %v253_v48  ;;  %v333_v50 = vmul.f32 %v322_v40, %v251_v2  ;;  %v334_v51 = vmul.f32 %v326_v44, %v250_v3  ;;  %v307_v4 = vrot.slane %v300_v5, %v476_v22 }
 0x129   :  { %v339_v52 = vcombine.low %v331_v49, %v332_v47  ;;  %v340_v53 = vcombine.low %v333_v50, %v334_v51  ;;  %v309_v59 = vadd.f32 %v307_v4, %v254_v57 }
 0x12b   :  { %v347_v55 = vrot.slane %v339_v52, %v476_v22  ;;  %v354_v56 = vrot.slane %v340_v53, %v476_v22 }
 0x12d   :  { %v355_v58 = vcombine.low %v347_v55, %v354_v56 }
 0x12f   :  { %v362_v60 = vrot.slane %v355_v58, %v476_v22 }
 0x131   :  { %v364_v61 = vadd.f32 %v362_v60, %v309_v59 }
 0x133   :  { %v365_v62 = vadd.f32 %v364_v61, %v40_v13 }
 0x135   :  { %v366_v1 = vmax.f32 %v365_v62, 0.0 }
 0x137   :  { %v367_v8 = vmul.f32 %v366_v1, %v42_v63 }
 0x139   :  { %v368_v9 = vadd.f32 %v367_v8, %v44_v7 }
 0x13b   :  { %v385_v11 = vmul.f32 -1.442695, %v368_v9 }
 0x13d   :  { %394 = vpow2.f32 %v385_v11 }
 0x14a   :  { %v395_v12 = vpop.eup %394 }
 0x14b   :  { %v372_v6 = vadd.f32 1.0, %v395_v12 }
 0x14d   :  { %396 = vrcp.f32 %v372_v6 }
 0x15a   :  { %v397_v10 = vpop.eup %396 }
 0x15b   :  { %379 = vst.msk [vmem:[%s532_s2] sm:$0xf] %vm377_vm4, %v397_v10 }
 0x15c   :  { %384 = vsyncpa [#allocation3], 1 }

</bundles_post_ra>
